<compile_context>
chip_gen: v7x
topology: tpu7x:2x2x1
jax: 0.10.0
libtpu: 0.0.40
codegen_flags: <defaults>
</compile_context>

<pallas_src>
import jax
import jax.numpy as jnp
from jax import lax
from jax.experimental import pallas as pl
from jax.experimental.pallas import tpu as pltpu

VMEM_SPEC = pl.BlockSpec(memory_space=pltpu.MemorySpace.VMEM)


# ---------------------------------------------------------------- fused kernel
def _make_fused_kernel(n_layers):
    """Builds the fused forward kernel for a fixed number of MLP layers.

    Ref order (all VMEM, full arrays):
      obs, action, patches,
      W0, b0, ..., W_{n-1}, b_{n-1},
      Wa, ba,            (action linear)
      Wc3, bc3,          (conv weight (Cout,1,Cin*k^3), bias (Cout,1,1))
      Wo_obs, Wo_ter3,   (head weight split: (h_last,oc), (Cout,P,oc))
      Wo_act, bo,        ((af,oc), (1,oc))
      mean_w,            ((oc,1) filled with 1/oc)
      out                ((B_pad, 1))
    """

    def kernel(*refs):
        out_ref = refs[-1]
        it = iter(refs[:-1])
        obs_ref = next(it)
        act_ref = next(it)
        patches_ref = next(it)

        # --- observation MLP: L0 -> relu -> L1 -> relu -> L2 (no relu on last)
        x = obs_ref[...]
        for li in range(n_layers):
            w = next(it)[...]
            b = next(it)[...]
            x = jnp.dot(x, w, preferred_element_type=jnp.float32) + b
            if li < n_layers - 1:
                x = jnp.maximum(x, 0.0)

        # --- action branch
        wa = next(it)[...]
        ba = next(it)[...]
        a = jnp.dot(act_ref[...], wa, preferred_element_type=jnp.float32) + ba

        # --- terrain branch: Conv3d as per-channel GEMM rows over im2col patches,
        #     immediately folded into a batch-invariant head-bias row
        #     (flatten order c*P + p matches row-major (Cout, P)).
        wc_ref = next(it)              # (Cout, 1, Cin*k^3)
        bc_ref = next(it)              # (Cout, 1, 1)
        wo_obs = next(it)[...]         # (h_last, oc)
        wot_ref = next(it)             # (Cout, P, oc)
        wo_act = next(it)[...]         # (af, oc)
        bo = next(it)[...]             # (1, oc)
        mean_w = next(it)[...]         # (oc, 1), each entry 1/oc

        patches = patches_ref[...]     # (Cin*k^3, P)
        c_out = wc_ref.shape[0]
        t_bias = bo                    # (1, oc)
        for c in range(c_out):
            row = (jnp.dot(wc_ref[c], patches,
                           preferred_element_type=jnp.float32) + bc_ref[c])  # (1, P)
            t_bias = t_bias + jnp.dot(row, wot_ref[c],
                                      preferred_element_type=jnp.float32)    # (1, oc)

        # --- head: split matmuls + folded terrain bias, ReLU, mean via dot
        y = (jnp.dot(x, wo_obs, preferred_element_type=jnp.float32)
             + jnp.dot(a, wo_act, preferred_element_type=jnp.float32)
             + t_bias)
        y = jnp.maximum(y, 0.0)
        out_ref[...] = jnp.dot(y, mean_w, preferred_element_type=jnp.float32)

    return kernel


# ---------------------------------------------------------------- helpers
def im2col_3d(x, k):
    # x: (Cin, D, H, W), valid conv, stride 1 -> (Cin*k^3, Do*Ho*Wo)
    cin, d, h, w = x.shape
    do, ho, wo = d - k + 1, h - k + 1, w - k + 1
    slabs = []
    for kd in range(k):
        for kh in range(k):
            for kw in range(k):
                slabs.append(x[:, kd:kd + do, kh:kh + ho, kw:kw + wo])
    p = jnp.stack(slabs, axis=1)                 # (Cin, k^3, Do, Ho, Wo)
    return p.reshape(cin * k ** 3, do * ho * wo)


# ---------------------------------------------------------------- forward
def critic_forward(params, observations, terrain, action):
    if terrain.ndim > 5:
        terrain = terrain[0]

    B = observations.shape[0]
    b_pad = max(8, ((B + 7) // 8) * 8)           # f32 sublane padding
    obs_p = jnp.zeros((b_pad, observations.shape[1]), jnp.float32).at[:B].set(observations)
    act_p = jnp.zeros((b_pad, action.shape[1]), jnp.float32).at[:B].set(action)

    # --- terrain im2col (batch-invariant).
    # TODO(synk): PyTorch does a host round-trip via .data.cpu().numpy() and broadcasts
    #             the single terrain result across the batch; replaced by folding the
    #             batch-invariant conv output into the head bias inside the kernel.
    k = params["Wc5"].shape[-1]
    patches = im2col_3d(terrain[0], k)           # (Cin*k^3, P)

    n_layers = len(params["W"])
    h_last = params["W"][-1].shape[1]
    c_out = params["Wc"].shape[0]
    P = patches.shape[1]
    oc = params["Wo"].shape[1]

    # --- split head weight row-wise: [obs | terrain | action]
    wo = params["Wo"]
    wo_obs = wo[:h_last]
    wo_ter3 = wo[h_last:h_last + c_out * P].reshape(c_out, P, oc)
    wo_act = wo[h_last + c_out * P:]
    wc3 = params["Wc"].reshape(c_out, 1, -1)
    bc3 = params["bc"].reshape(c_out, 1, 1)
    mean_w = jnp.full((oc, 1), 1.0 / oc, jnp.float32)

    inputs = [obs_p, act_p, patches]
    for li in range(n_layers):
        inputs += [params["W"][li], params["b"][li]]
    inputs += [params["Wa"], params["ba"], wc3, bc3,
               wo_obs, wo_ter3, wo_act, params["bo"], mean_w]

    out_pad = pl.pallas_call(
        _make_fused_kernel(n_layers),
        out_shape=jax.ShapeDtypeStruct((b_pad, 1), jnp.float32),
        in_specs=[VMEM_SPEC] * len(inputs),
        out_specs=VMEM_SPEC,
    )(*inputs)
    return out_pad[:B]


# ---------------------------------------------------------------- reference (plain JAX)
def reference_forward(params, observations, terrain, action):
    if terrain.ndim > 5:
        terrain = terrain[0]
    W, b = params["W"], params["b"]
    out = observations @ W[0] + b[0]
    for li in range(1, len(W)):
        out = jnp.maximum(out, 0.0)
        out = out @ W[li] + b[li]
    conv = lax.conv_general_dilated(
        terrain, params["Wc5"], window_strides=(1, 1, 1), padding="VALID",
        dimension_numbers=("NCDHW", "OIDHW", "NCDHW"))
    conv = conv + params["bc"].reshape(1, -1, 1, 1, 1)
    out_t_vec = conv.reshape(-1)
    out_t = jnp.broadcast_to(out_t_vec[None, :], (out.shape[0], out_t_vec.shape[0]))
    out_a = action @ params["Wa"] + params["ba"]
    cat = jnp.concatenate([out, out_t, out_a], axis=1)
    y = jnp.maximum(cat @ params["Wo"] + params["bo"], 0.0)
    return jnp.mean(y, axis=1, keepdims=True)


# ---------------------------------------------------------------- params
def init_params(key, obs_dim, action_dim, terrain_dim, terrain_output,
                hidden, k, action_features_out, init_w=0.003):
    output_critic = int(round(action_dim / 2))
    keys = iter(jax.random.split(key, 32))

    def unif(shape, bound):
        return jax.random.uniform(next(keys), shape, jnp.float32, -bound, bound)

    params = {"W": [], "b": []}
    dims = [obs_dim] + hidden
    for li in range(len(hidden)):
        din, dout = dims[li], dims[li + 1]
        # fanin_init (uses weight.size()[0] == out_features) for all but last; last uses init_w
        bound = (1.0 / float(dout) ** 0.5) if li < len(hidden) - 1 else init_w
        params["W"].append(unif((din, dout), bound))
        params["b"].append(unif((1, dout), bound))

    # Conv3d(terrain_dim -> terrain_output, kernel k)
    cbound = 1.0 / float(terrain_dim * k ** 3) ** 0.5
    wc5 = unif((terrain_output, terrain_dim, k, k, k), cbound)
    params["Wc5"] = wc5
    params["Wc"] = wc5.reshape(terrain_output, terrain_dim * k ** 3)
    params["bc"] = unif((terrain_output, 1), cbound)

    # action layer
    abound = 1.0 / float(action_dim) ** 0.5
    params["Wa"] = unif((action_dim, action_features_out), abound)
    params["ba"] = unif((1, action_features_out), abound)

    # output layer
    head_in = hidden[-1] + terrain_output ** 2 + action_features_out
    obound = 1.0 / float(head_in) ** 0.5
    params["Wo"] = unif((head_in, output_critic), obound)
    params["bo"] = unif((1, output_critic), obound)
    return params


# ---------------------------------------------------------------- main
if __name__ == "__main__":
    B = 2
    obs_dim, action_dim = 12, 6             # output_critic = round(6/2) = 3
    terrain_dim, terrain_output = 2, 4
    hidden = [32, 24, 16]
    k = 3
    action_features_out = 5
    D, H, W = 6, 3, 3                        # conv out spatial 4*1*1; flat = 4*4 = terrain_output**2

    params = init_params(jax.random.PRNGKey(42), obs_dim, action_dim,
                         terrain_dim, terrain_output, hidden, k, action_features_out)

    k1, k2, k3 = jax.random.split(jax.random.PRNGKey(0), 3)
    observations = jax.random.normal(k1, (B, obs_dim), jnp.float32)
    terrain = jax.random.normal(k2, (1, terrain_dim, D, H, W), jnp.float32)
    action = jax.random.normal(k3, (B, action_dim), jnp.float32)

    fwd = jax.jit(critic_forward)
    out = fwd(params, observations, terrain, action)
    out = jax.block_until_ready(out)
    assert out.shape == (B, 1), out.shape

    ref = reference_forward(params, observations, terrain, action)
    assert jnp.allclose(out, ref, atol=1e-4, rtol=1e-4), (out, ref)

    print("KERNEL_OK")
</pallas_src>

<mosaic_0001>
module attributes {stable_mosaic.version = 11 : i64} {
  func.func @kernel(%arg0: memref<8x12xf32, #tpu.memory_space<vmem>>, %arg1: memref<8x6xf32, #tpu.memory_space<vmem>>, %arg2: memref<54x4xf32, #tpu.memory_space<vmem>>, %arg3: memref<12x32xf32, #tpu.memory_space<vmem>>, %arg4: memref<1x32xf32, #tpu.memory_space<vmem>>, %arg5: memref<32x24xf32, #tpu.memory_space<vmem>>, %arg6: memref<1x24xf32, #tpu.memory_space<vmem>>, %arg7: memref<24x16xf32, #tpu.memory_space<vmem>>, %arg8: memref<1x16xf32, #tpu.memory_space<vmem>>, %arg9: memref<6x5xf32, #tpu.memory_space<vmem>>, %arg10: memref<1x5xf32, #tpu.memory_space<vmem>>, %arg11: memref<4x1x54xf32, #tpu.memory_space<vmem>>, %arg12: memref<4x1x1xf32, #tpu.memory_space<vmem>>, %arg13: memref<16x3xf32, #tpu.memory_space<vmem>>, %arg14: memref<4x4x3xf32, #tpu.memory_space<vmem>>, %arg15: memref<5x3xf32, #tpu.memory_space<vmem>>, %arg16: memref<1x3xf32, #tpu.memory_space<vmem>>, %arg17: memref<3x1xf32, #tpu.memory_space<vmem>>, %arg18: memref<8x1xf32, #tpu.memory_space<vmem>>) attributes {dimension_semantics = [], scalar_prefetch = 0 : i64, scratch_operands = 0 : i64, tpu.core_type = #tpu.core_type<tc>} {
    %c0 = arith.constant 0 : index
    %c0_0 = arith.constant 0 : index
    %0 = vector.load %arg0[%c0, %c0_0] : memref<8x12xf32, #tpu.memory_space<vmem>>, vector<8x12xf32>
    %c0_1 = arith.constant 0 : index
    %c0_2 = arith.constant 0 : index
    %1 = vector.load %arg3[%c0_1, %c0_2] : memref<12x32xf32, #tpu.memory_space<vmem>>, vector<12x32xf32>
    %c0_3 = arith.constant 0 : index
    %c0_4 = arith.constant 0 : index
    %2 = vector.load %arg4[%c0_3, %c0_4] : memref<1x32xf32, #tpu.memory_space<vmem>>, vector<1x32xf32>
    %cst = arith.constant dense<0.000000e+00> : vector<8x32xf32>
    %3 = tpu.matmul %0, %1, %cst {dimension_numbers = #tpu.dot_dimension_numbers<[1], [0], [0], [1], [0, 0, 1, 1], [], []>} : vector<8x12xf32>, vector<12x32xf32>, vector<8x32xf32> -> vector<8x32xf32>
    %4 = vector.broadcast %2 : vector<1x32xf32> to vector<8x32xf32>
    %5 = arith.addf %3, %4 : vector<8x32xf32>
    %cst_5 = arith.constant 0.000000e+00 : f32
    %6 = vector.broadcast %cst_5 : f32 to vector<8x32xf32>
    %7 = arith.maximumf %5, %6 : vector<8x32xf32>
    %c0_6 = arith.constant 0 : index
    %c0_7 = arith.constant 0 : index
    %8 = vector.load %arg5[%c0_6, %c0_7] : memref<32x24xf32, #tpu.memory_space<vmem>>, vector<32x24xf32>
    %c0_8 = arith.constant 0 : index
    %c0_9 = arith.constant 0 : index
    %9 = vector.load %arg6[%c0_8, %c0_9] : memref<1x24xf32, #tpu.memory_space<vmem>>, vector<1x24xf32>
    %cst_10 = arith.constant dense<0.000000e+00> : vector<8x24xf32>
    %10 = tpu.matmul %7, %8, %cst_10 {dimension_numbers = #tpu.dot_dimension_numbers<[1], [0], [0], [1], [0, 0, 1, 1], [], []>} : vector<8x32xf32>, vector<32x24xf32>, vector<8x24xf32> -> vector<8x24xf32>
    %11 = vector.broadcast %9 : vector<1x24xf32> to vector<8x24xf32>
    %12 = arith.addf %10, %11 : vector<8x24xf32>
    %cst_11 = arith.constant 0.000000e+00 : f32
    %13 = vector.broadcast %cst_11 : f32 to vector<8x24xf32>
    %14 = arith.maximumf %12, %13 : vector<8x24xf32>
    %c0_12 = arith.constant 0 : index
    %c0_13 = arith.constant 0 : index
    %15 = vector.load %arg7[%c0_12, %c0_13] : memref<24x16xf32, #tpu.memory_space<vmem>>, vector<24x16xf32>
    %c0_14 = arith.constant 0 : index
    %c0_15 = arith.constant 0 : index
    %16 = vector.load %arg8[%c0_14, %c0_15] : memref<1x16xf32, #tpu.memory_space<vmem>>, vector<1x16xf32>
    %cst_16 = arith.constant dense<0.000000e+00> : vector<8x16xf32>
    %17 = tpu.matmul %14, %15, %cst_16 {dimension_numbers = #tpu.dot_dimension_numbers<[1], [0], [0], [1], [0, 0, 1, 1], [], []>} : vector<8x24xf32>, vector<24x16xf32>, vector<8x16xf32> -> vector<8x16xf32>
    %18 = vector.broadcast %16 : vector<1x16xf32> to vector<8x16xf32>
    %19 = arith.addf %17, %18 : vector<8x16xf32>
    %c0_17 = arith.constant 0 : index
    %c0_18 = arith.constant 0 : index
    %20 = vector.load %arg9[%c0_17, %c0_18] : memref<6x5xf32, #tpu.memory_space<vmem>>, vector<6x5xf32>
    %c0_19 = arith.constant 0 : index
    %c0_20 = arith.constant 0 : index
    %21 = vector.load %arg10[%c0_19, %c0_20] : memref<1x5xf32, #tpu.memory_space<vmem>>, vector<1x5xf32>
    %c0_21 = arith.constant 0 : index
    %c0_22 = arith.constant 0 : index
    %22 = vector.load %arg1[%c0_21, %c0_22] : memref<8x6xf32, #tpu.memory_space<vmem>>, vector<8x6xf32>
    %cst_23 = arith.constant dense<0.000000e+00> : vector<8x5xf32>
    %23 = tpu.matmul %22, %20, %cst_23 {dimension_numbers = #tpu.dot_dimension_numbers<[1], [0], [0], [1], [0, 0, 1, 1], [], []>} : vector<8x6xf32>, vector<6x5xf32>, vector<8x5xf32> -> vector<8x5xf32>
    %24 = vector.broadcast %21 : vector<1x5xf32> to vector<8x5xf32>
    %25 = arith.addf %23, %24 : vector<8x5xf32>
    %c0_24 = arith.constant 0 : index
    %c0_25 = arith.constant 0 : index
    %26 = vector.load %arg13[%c0_24, %c0_25] : memref<16x3xf32, #tpu.memory_space<vmem>>, vector<16x3xf32>
    %c0_26 = arith.constant 0 : index
    %c0_27 = arith.constant 0 : index
    %27 = vector.load %arg15[%c0_26, %c0_27] : memref<5x3xf32, #tpu.memory_space<vmem>>, vector<5x3xf32>
    %c0_28 = arith.constant 0 : index
    %c0_29 = arith.constant 0 : index
    %28 = vector.load %arg16[%c0_28, %c0_29] : memref<1x3xf32, #tpu.memory_space<vmem>>, vector<1x3xf32>
    %c0_30 = arith.constant 0 : index
    %c0_31 = arith.constant 0 : index
    %29 = vector.load %arg17[%c0_30, %c0_31] : memref<3x1xf32, #tpu.memory_space<vmem>>, vector<3x1xf32>
    %c0_32 = arith.constant 0 : index
    %c0_33 = arith.constant 0 : index
    %30 = vector.load %arg2[%c0_32, %c0_33] : memref<54x4xf32, #tpu.memory_space<vmem>>, vector<54x4xf32>
    %c0_34 = arith.constant 0 : index
    %c0_35 = arith.constant 0 : index
    %c0_36 = arith.constant 0 : index
    %31 = vector.load %arg11[%c0_34, %c0_35, %c0_36] : memref<4x1x54xf32, #tpu.memory_space<vmem>>, vector<1x1x54xf32>
    %32 = vector.shape_cast %31 : vector<1x1x54xf32> to vector<1x54xf32>
    %cst_37 = arith.constant dense<0.000000e+00> : vector<1x4xf32>
    %33 = tpu.matmul %32, %30, %cst_37 {dimension_numbers = #tpu.dot_dimension_numbers<[1], [0], [0], [1], [0, 0, 1, 1], [], []>} : vector<1x54xf32>, vector<54x4xf32>, vector<1x4xf32> -> vector<1x4xf32>
    %c0_38 = arith.constant 0 : index
    %c0_39 = arith.constant 0 : index
    %c0_40 = arith.constant 0 : index
    %34 = vector.load %arg12[%c0_38, %c0_39, %c0_40] : memref<4x1x1xf32, #tpu.memory_space<vmem>>, vector<1x1x1xf32>
    %35 = vector.shape_cast %34 : vector<1x1x1xf32> to vector<1x1xf32>
    %36 = vector.broadcast %35 : vector<1x1xf32> to vector<1x4xf32>
    %37 = arith.addf %33, %36 : vector<1x4xf32>
    %c0_41 = arith.constant 0 : index
    %c0_42 = arith.constant 0 : index
    %c0_43 = arith.constant 0 : index
    %38 = vector.load %arg14[%c0_41, %c0_42, %c0_43] : memref<4x4x3xf32, #tpu.memory_space<vmem>>, vector<1x4x3xf32>
    %39 = vector.shape_cast %38 : vector<1x4x3xf32> to vector<4x3xf32>
    %cst_44 = arith.constant dense<0.000000e+00> : vector<1x3xf32>
    %40 = tpu.matmul %37, %39, %cst_44 {dimension_numbers = #tpu.dot_dimension_numbers<[1], [0], [0], [1], [0, 0, 1, 1], [], []>} : vector<1x4xf32>, vector<4x3xf32>, vector<1x3xf32> -> vector<1x3xf32>
    %41 = arith.addf %28, %40 : vector<1x3xf32>
    %c1 = arith.constant 1 : index
    %c0_45 = arith.constant 0 : index
    %c0_46 = arith.constant 0 : index
    %42 = vector.load %arg11[%c1, %c0_45, %c0_46] : memref<4x1x54xf32, #tpu.memory_space<vmem>>, vector<1x1x54xf32>
    %43 = vector.shape_cast %42 : vector<1x1x54xf32> to vector<1x54xf32>
    %cst_47 = arith.constant dense<0.000000e+00> : vector<1x4xf32>
    %44 = tpu.matmul %43, %30, %cst_47 {dimension_numbers = #tpu.dot_dimension_numbers<[1], [0], [0], [1], [0, 0, 1, 1], [], []>} : vector<1x54xf32>, vector<54x4xf32>, vector<1x4xf32> -> vector<1x4xf32>
    %c1_48 = arith.constant 1 : index
    %c0_49 = arith.constant 0 : index
    %c0_50 = arith.constant 0 : index
    %45 = vector.load %arg12[%c1_48, %c0_49, %c0_50] : memref<4x1x1xf32, #tpu.memory_space<vmem>>, vector<1x1x1xf32>
    %46 = vector.shape_cast %45 : vector<1x1x1xf32> to vector<1x1xf32>
    %47 = vector.broadcast %46 : vector<1x1xf32> to vector<1x4xf32>
    %48 = arith.addf %44, %47 : vector<1x4xf32>
    %c1_51 = arith.constant 1 : index
    %c0_52 = arith.constant 0 : index
    %c0_53 = arith.constant 0 : index
    %49 = vector.load %arg14[%c1_51, %c0_52, %c0_53] : memref<4x4x3xf32, #tpu.memory_space<vmem>>, vector<1x4x3xf32>
    %50 = vector.shape_cast %49 : vector<1x4x3xf32> to vector<4x3xf32>
    %cst_54 = arith.constant dense<0.000000e+00> : vector<1x3xf32>
    %51 = tpu.matmul %48, %50, %cst_54 {dimension_numbers = #tpu.dot_dimension_numbers<[1], [0], [0], [1], [0, 0, 1, 1], [], []>} : vector<1x4xf32>, vector<4x3xf32>, vector<1x3xf32> -> vector<1x3xf32>
    %52 = arith.addf %41, %51 : vector<1x3xf32>
    %c2 = arith.constant 2 : index
    %c0_55 = arith.constant 0 : index
    %c0_56 = arith.constant 0 : index
    %53 = vector.load %arg11[%c2, %c0_55, %c0_56] : memref<4x1x54xf32, #tpu.memory_space<vmem>>, vector<1x1x54xf32>
    %54 = vector.shape_cast %53 : vector<1x1x54xf32> to vector<1x54xf32>
    %cst_57 = arith.constant dense<0.000000e+00> : vector<1x4xf32>
    %55 = tpu.matmul %54, %30, %cst_57 {dimension_numbers = #tpu.dot_dimension_numbers<[1], [0], [0], [1], [0, 0, 1, 1], [], []>} : vector<1x54xf32>, vector<54x4xf32>, vector<1x4xf32> -> vector<1x4xf32>
    %c2_58 = arith.constant 2 : index
    %c0_59 = arith.constant 0 : index
    %c0_60 = arith.constant 0 : index
    %56 = vector.load %arg12[%c2_58, %c0_59, %c0_60] : memref<4x1x1xf32, #tpu.memory_space<vmem>>, vector<1x1x1xf32>
    %57 = vector.shape_cast %56 : vector<1x1x1xf32> to vector<1x1xf32>
    %58 = vector.broadcast %57 : vector<1x1xf32> to vector<1x4xf32>
    %59 = arith.addf %55, %58 : vector<1x4xf32>
    %c2_61 = arith.constant 2 : index
    %c0_62 = arith.constant 0 : index
    %c0_63 = arith.constant 0 : index
    %60 = vector.load %arg14[%c2_61, %c0_62, %c0_63] : memref<4x4x3xf32, #tpu.memory_space<vmem>>, vector<1x4x3xf32>
    %61 = vector.shape_cast %60 : vector<1x4x3xf32> to vector<4x3xf32>
    %cst_64 = arith.constant dense<0.000000e+00> : vector<1x3xf32>
    %62 = tpu.matmul %59, %61, %cst_64 {dimension_numbers = #tpu.dot_dimension_numbers<[1], [0], [0], [1], [0, 0, 1, 1], [], []>} : vector<1x4xf32>, vector<4x3xf32>, vector<1x3xf32> -> vector<1x3xf32>
    %63 = arith.addf %52, %62 : vector<1x3xf32>
    %c3 = arith.constant 3 : index
    %c0_65 = arith.constant 0 : index
    %c0_66 = arith.constant 0 : index
    %64 = vector.load %arg11[%c3, %c0_65, %c0_66] : memref<4x1x54xf32, #tpu.memory_space<vmem>>, vector<1x1x54xf32>
    %65 = vector.shape_cast %64 : vector<1x1x54xf32> to vector<1x54xf32>
    %cst_67 = arith.constant dense<0.000000e+00> : vector<1x4xf32>
    %66 = tpu.matmul %65, %30, %cst_67 {dimension_numbers = #tpu.dot_dimension_numbers<[1], [0], [0], [1], [0, 0, 1, 1], [], []>} : vector<1x54xf32>, vector<54x4xf32>, vector<1x4xf32> -> vector<1x4xf32>
    %c3_68 = arith.constant 3 : index
    %c0_69 = arith.constant 0 : index
    %c0_70 = arith.constant 0 : index
    %67 = vector.load %arg12[%c3_68, %c0_69, %c0_70] : memref<4x1x1xf32, #tpu.memory_space<vmem>>, vector<1x1x1xf32>
    %68 = vector.shape_cast %67 : vector<1x1x1xf32> to vector<1x1xf32>
    %69 = vector.broadcast %68 : vector<1x1xf32> to vector<1x4xf32>
    %70 = arith.addf %66, %69 : vector<1x4xf32>
    %c3_71 = arith.constant 3 : index
    %c0_72 = arith.constant 0 : index
    %c0_73 = arith.constant 0 : index
    %71 = vector.load %arg14[%c3_71, %c0_72, %c0_73] : memref<4x4x3xf32, #tpu.memory_space<vmem>>, vector<1x4x3xf32>
    %72 = vector.shape_cast %71 : vector<1x4x3xf32> to vector<4x3xf32>
    %cst_74 = arith.constant dense<0.000000e+00> : vector<1x3xf32>
    %73 = tpu.matmul %70, %72, %cst_74 {dimension_numbers = #tpu.dot_dimension_numbers<[1], [0], [0], [1], [0, 0, 1, 1], [], []>} : vector<1x4xf32>, vector<4x3xf32>, vector<1x3xf32> -> vector<1x3xf32>
    %74 = arith.addf %63, %73 : vector<1x3xf32>
    %cst_75 = arith.constant dense<0.000000e+00> : vector<8x3xf32>
    %75 = tpu.matmul %19, %26, %cst_75 {dimension_numbers = #tpu.dot_dimension_numbers<[1], [0], [0], [1], [0, 0, 1, 1], [], []>} : vector<8x16xf32>, vector<16x3xf32>, vector<8x3xf32> -> vector<8x3xf32>
    %cst_76 = arith.constant dense<0.000000e+00> : vector<8x3xf32>
    %76 = tpu.matmul %25, %27, %cst_76 {dimension_numbers = #tpu.dot_dimension_numbers<[1], [0], [0], [1], [0, 0, 1, 1], [], []>} : vector<8x5xf32>, vector<5x3xf32>, vector<8x3xf32> -> vector<8x3xf32>
    %77 = arith.addf %75, %76 : vector<8x3xf32>
    %78 = vector.broadcast %74 : vector<1x3xf32> to vector<8x3xf32>
    %79 = arith.addf %77, %78 : vector<8x3xf32>
    %cst_77 = arith.constant 0.000000e+00 : f32
    %80 = vector.broadcast %cst_77 : f32 to vector<8x3xf32>
    %81 = arith.maximumf %79, %80 : vector<8x3xf32>
    %cst_78 = arith.constant dense<0.000000e+00> : vector<8x1xf32>
    %82 = tpu.matmul %81, %29, %cst_78 {dimension_numbers = #tpu.dot_dimension_numbers<[1], [0], [0], [1], [0, 0, 1, 1], [], []>} : vector<8x3xf32>, vector<3x1xf32>, vector<8x1xf32> -> vector<8x1xf32>
    %c0_79 = arith.constant 0 : index
    %c0_80 = arith.constant 0 : index
    %83 = vector.load %arg18[%c0_79, %c0_80] : memref<8x1xf32, #tpu.memory_space<vmem>>, vector<8x1xf32>
    tpu.vector_store %arg18[%c0_79, %c0_80], %82 {strides = array<i32>} : memref<8x1xf32, #tpu.memory_space<vmem>>, vector<8x1xf32>,
    return
  }
}

</mosaic_0001>

<bundles_post_ra>
// kernel: critic_forward.1
= control target key start
LH: loop header
LB: loop body
LE: loop exit
PB: predicated region body
PF: predicated region fallthrough
CT: control target
= control target key end

     0   :  { %vm73_vm0 = vcmask 1043456   ;;  %v1627_v0 = vmov 0.0|0.0   ;;  %vm1628_vm1 = vmmov 1   ;;  %vm1629_vm3 = vmmov 0   ;;  %s1961_s3 = inlined_call_operand.vmem [shape: f32[12,32], index: 3, kind: input, shape index: {}]   ;;  %s1962_s5 = inlined_call_operand.vmem [shape: f32[32,24], index: 5, kind: input, shape index: {}]   ;;  %s1963_s0 = inlined_call_operand.vmem [shape: f32[8,12], index: 0, kind: input, shape index: {}]   ;;  %s1964_s7 = inlined_call_operand.vmem [shape: f32[24,16], index: 7, kind: input, shape index: {}]   ;;  %s1965_s4 = inlined_call_operand.vmem [shape: f32[1,32], index: 4, kind: input, shape index: {}]   ;;  %s1966_s12 = inlined_call_operand.vmem [shape: f32[4,1,1], index: 12, kind: input, shape index: {}]   ;;  %s1967_s6 = inlined_call_operand.vmem [shape: f32[1,24], index: 6, kind: input, shape index: {}]   ;;  %s1968_s2 = inlined_call_operand.vmem [shape: f32[54,4], index: 2, kind: input, shape index: {}]   ;;  %s1969_s11 = inlined_call_operand.vmem [shape: f32[4,1,54], index: 11, kind: input, shape index: {}]   ;;  %s1970_s9 = inlined_call_operand.vmem [shape: f32[6,5], index: 9, kind: input, shape index: {}]   ;;  %s1971_s1 = inlined_call_operand.vmem [shape: f32[8,6], index: 1, kind: input, shape index: {}]   ;;  %s1972_s14 = inlined_call_operand.vmem [shape: f32[4,4,3], index: 14, kind: input, shape index: {}]   ;;  %s1973_s15 = inlined_call_operand.vmem [shape: f32[5,3], index: 15, kind: input, shape index: {}]   ;;  %s1974_s13 = inlined_call_operand.vmem [shape: f32[16,3], index: 13, kind: input, shape index: {}]   ;;  %s1975_s10 = inlined_call_operand.vmem [shape: f32[1,5], index: 10, kind: input, shape index: {}]   ;;  %s1976_s8 = inlined_call_operand.vmem [shape: f32[1,16], index: 8, kind: input, shape index: {}]   ;;  %s1977_s17 = inlined_call_operand.vmem [shape: f32[3,1], index: 17, kind: input, shape index: {}]   ;;  %s1978_s16 = inlined_call_operand.vmem [shape: f32[1,3], index: 16, kind: input, shape index: {}]   ;;  %s1979_s18 = inlined_call_operand.vmem [shape: f32[8,1], index: 18, kind: output, shape index: {}]  }
   0x1   :  { %1982 = sst [smem:[#allocation2_spill]] %s1961_s3  ;;  %1561 = vmatprep.subr.bf16.mxu0 %v1627_v0  ;;  %vm1563_vm2 = vmpackc.low %vm73_vm0, %vm1628_vm1  ;;  %1565 = vmatprep.subr.bf16.mxu1 %v1627_v0  ;;  %v1630_v4 = vmov 0.0   ;;  %vm69_vm4 = vcmask 97280   ;;  %v234_v12 = vld [vmem:[%s1964_s7] sm:$0xff]  ;;  %v235_v13 = vld [vmem:[%s1964_s7 + $0x8] sm:$0xff]  ;;  %vm159_vm5 = vcmask 261120   ;;  %v424_v47 = vlaneseq }
   0x2   :  { %1983 = sst [smem:[#allocation3_spill]] %s1962_s5  ;;  %s1985_s29 = sld [smem:[#allocation2_spill]]  ;;  %1428 = vmatprep.mubr.msk.f32.mxu0 %vm1629_vm3, %v1630_v4  ;;  %1439 = vmatprep.mubr.msk.f32.mxu1 %vm1629_vm3, %v1630_v4  ;;  %v1572_v14 = vpack.c.bf16 %v235_v13, %v234_v12  ;;  %v1323_v15 = vld [vmem:[%s1965_s4] ss:$0 sm:$0xff]  ;;  %v236_v20 = vld [vmem:[%s1964_s7 + $0x10] sm:$0xff]  ;;  %v1631_v21 = vmov 0  }
   0x3   :  { %1984 = sst [smem:[#allocation4_spill]] %s1963_s0  ;;  %s1986_s20 = sld [smem:[#allocation3_spill]]  ;;  %1625 = vset.pattern.permute.xlu0 %v1631_v21  ;;  %v418_v22 = vld [vmem:[%s1966_s12] sm:$0x1]  ;;  %1626 = vset.pattern.permute.xlu1 %v1631_v21  ;;  %v1338_v23 = vld [vmem:[%s1966_s12 + $0x1] sm:$0x1] }
   0x4   :  { %s1987_s24 = sld [smem:[#allocation4_spill]]  ;;  %421 = vperm.xlu0 %1625, %v418_v22   ;;  %v1326_v24 = vld [vmem:[%s1967_s6] ss:$0 sm:$0xff]  ;;  %v411_v26 = vld [vmem:[%s1968_s2 + $0x8] sm:$0xff]  ;;  %vm244_vm6 = vcmask 195584   ;;  %v412_v32 = vld [vmem:[%s1968_s2 + $0x10] sm:$0xff] }
   0x5   :  { %v410_v25 = vld [vmem:[%s1968_s2] sm:$0xff]  ;;  %v413_v33 = vld [vmem:[%s1968_s2 + $0x18] sm:$0xff]  ;;  %v415_v36 = vld [vmem:[%s1968_s2 + $0x28] sm:$0xff]  ;;  %vm331_vm7 = vcmask 1045504   ;;  %vm428_vm8 = vcmask 441344   ;;  %vm327_vm9 = vcmask 48128  }
   0x6   :  { %v1791_v30 = vpack.c.bf16 %v411_v26, %v410_v25  ;;  %v1800_v34 = vpack.c.bf16 %v413_v33, %v412_v32  ;;  %v414_v35 = vld [vmem:[%s1968_s2 + $0x20] sm:$0xff]  ;;  %v1820_v38 = vld [vmem:[%s1968_s2 + $0x30] sm:$0x3f]  ;;  %v425_v50 = vshrl.u32 %v424_v47, 7  ;;  %vm506_vm10 = vcmask 31744  }
   0x7   :  { %v1812_v37 = vpack.c.bf16 %v415_v36, %v414_v35  ;;  %v417_v39 = vld [vmem:[%s1969_s11] sm:$0x1]  ;;  %v1344_v43 = vld [vmem:[%s1969_s11 + $0x2] sm:$0x1]  ;;  %v1352_v45 = vld [vmem:[%s1966_s12 + $0x3] sm:$0x1] }
   0x8   :  { %v60_v1 = vld [vmem:[%s1985_s29] sm:$0xff]  ;;  %v61_v2 = vld [vmem:[%s1985_s29 + $0x8] sm:$0xf]  ;;  %590 = vperm.xlu0 %1625, %v1338_v23   ;;  %v1881_v51 = vsub.s32 0, %v425_v50  ;;  %v1355_v12 = vld [vmem:[%s1972_s14 + $0xc] sm:$0xf] }
   0x9   :  { %v1562_v3 = vpack.c.bf16 %v61_v2, %v60_v1  ;;  %v148_v5 = vld [vmem:[%s1986_s20] sm:$0xff]  ;;  %v149_v6 = vld [vmem:[%s1986_s20 + $0x8] sm:$0xff]  ;;  %v150_v9 = vld [vmem:[%s1986_s20 + $0x10] sm:$0xff]  ;;  %vm1083_vm11 = vcmask 1044480   ;;  %vm1079_vm12 = vcmask 39936   ;;  %vm1157_vm13 = vcmask 130048  }
   0xa   :  { %v1566_v7 = vpack.c.bf16 %v149_v6, %v148_v5  ;;  %v59_v8 = vld [vmem:[%s1987_s24] sm:$0xff]  ;;  %v151_v10 = vld [vmem:[%s1986_s20 + $0x18] sm:$0xff]  ;;  %vm1243_vm14 = vcmask 1042432   ;;  %vm1239_vm15 = vcmask 23552  }
   0xb   :  { %1564 = vmatpush3.bf16.msk.msra.mxu0 %vm1563_vm2, %v1562_v3  ;;  %v1569_v11 = vpack.c.bf16 %v151_v10, %v150_v9  ;;  %v318_v40 = vld [vmem:[%s1970_s9] sm:$0x3f] }
   0xc   :  { %1567 = vmatpush3.bf16.msra.mxu1 %v1566_v7  ;;  %1571 = vmatprep.subr.bf16.mxu0 %v1627_v0  ;;  %v320_v41 = vld [vmem:[%s1971_s1] sm:$0xff] }
   0xd   :  { %1568 = vmatprep.subr.bf16.mxu1 %v1627_v0  ;;  %v505_v42 = vld [vmem:[%s1972_s14] sm:$0xf]  ;;  %v1341_v58 = vld [vmem:[%s1972_s14 + $0x4] sm:$0xf] }
   0xe   :  { %1429 = vmatmul.mubr.msk.f32.vlgmr.msra.gmra.mrb[0].mxu0 %vm69_vm4, %v59_v8  ;;  %v1345_v44 = vld [vmem:[%s1966_s12 + $0x2] sm:$0x1]  ;;  %v1351_v46 = vld [vmem:[%s1969_s11 + $0x3] sm:$0x1]  ;;  %v1337_v57 = vld [vmem:[%s1969_s11 + $0x1] sm:$0x1] }
   0xf   :  { %1448 = vmatprep.mubr.msk.f32.mxu0 %vm1629_vm3, %v1630_v4  ;;  %1573 = vmatpush3.bf16.msra.mxu0 %v1572_v14  ;;  %v1348_v8 = vld [vmem:[%s1972_s14 + $0x8] sm:$0xf]  ;;  %v1328_v22 = vld [vmem:[%s1976_s8] ss:$0 sm:$0xff] }
  0x10   :  { %1570 = vmatpush3.bf16.msra.mxu1 %v1569_v11  ;;  %1446 = vmatprep.subr.mxu0 %v1630_v4  ;;  %v408_v26 = vld [vmem:[%s1978_s16] sm:$0x1] }
  0x11   :  { %1451 = vmatprep.subr.mxu1 %v1630_v4  ;;  %755 = vperm.xlu1 %1626, %v1345_v44  }
  0x13   :  { %1447 = vmatpush3.msra.mxu0 %v236_v20 }
  0x14   :  { %1574 = vmatprep.subr.bf16.mxu0 %v1627_v0 }
  0x15   :  { %920 = vperm.xlu1 %1626, %v1352_v45  }
  0x83   :  { %v422_v52 = vpop.permute.xlu0 %421 }
  0x84   :  { %v427_v53 = vrot.slane %v422_v52, %v1881_v51 }
  0x87   :  { %v591_v2 = vpop.permute.xlu0 %590 }
  0x88   :  { %v596_v3 = vrot.slane %v591_v2, %v1881_v51 }
  0x90   :  { %v756_v9 = vpop.permute.xlu1 %755 }
  0x91   :  { %v761_v10 = vrot.slane %v756_v9, %v1881_v51 }
  0x94   :  { %v921_v13 = vpop.permute.xlu1 %920 }
  0x95   :  { %v926_v14 = vrot.slane %v921_v13, %v1881_v51 }
  0xe1   :  { %v143_v16 = vpop.f32.mrb[0].mxu0 }
  0xe2   :  { %v144_v17 = vadd.f32 %v1323_v15, %v143_v16  ;;  %v1430_v18 = vpop.f32.mrb[1].mxu0  ;;  %v407_v16 = vld [vmem:[%s1973_s15] sm:$0x1f] }
  0xe3   :  { %v406_v18 = vld [vmem:[%s1974_s13 + $0x8] sm:$0xff] }
  0xe4   :  { %v147_v19 = vmax.f32 %v144_v17, 0.0  ;;  %v405_v17 = vld [vmem:[%s1974_s13] sm:$0xff] }
  0xe5   :  { %v1611_v20 = vpack.c.bf16 %v406_v18, %v405_v17 }
  0xe6   :  { %1440 = vmatmul.mubr.msk.f32.vlgmr.msra.gmra.mrb[0].mxu1 %vm159_vm5, %v147_v19  ;;  %v1330_v19 = vld [vmem:[%s1975_s10] ss:$0 sm:$0xff] }
  0xe7   :  { %1453 = vmatprep.mubr.msk.f32.mxu1 %vm1629_vm3, %v1630_v4  ;;  %1452 = vmatpush3.msk.msra.mxu1 %vm331_vm7, %v318_v40 }
  0xe8   :  { %1473 = vmatprep.subr.mxu1 %v1630_v4 }
  0xea   :  { %1454 = vmatmul.mubr.msk.f32.vlgmr.msra.gmra.mrb[2].mxu1 %vm327_vm9, %v320_v41 }
  0xeb   :  { %1474 = vmatpush3.msk.msra.mxu1 %vm73_vm0, %v505_v42  ;;  %1475 = vmatprep.mubr.msk.f32.mxu1 %vm1629_vm3, %v1630_v4 }
  0xec   :  { %1583 = vmatprep.subr.bf16.mxu1 %v1627_v0 }
 0x1b9   :  { %v229_v27 = vpop.f32.mrb[0].mxu1 }
 0x1ba   :  { %v230_v28 = vadd.f32 %v1326_v24, %v229_v27  ;;  %v1441_v29 = vpop.f32.mrb[1].mxu1 }
 0x1bc   :  { %v233_v31 = vmax.f32 %v230_v28, 0.0 }
 0x1bd   :  { %v401_v59 = vpop.f32.mrb[2].mxu1 }
 0x1be   :  { %1449 = vmatmul.mubr.msk.f32.vlgmr.msra.gmra.mrb[2].mxu0 %vm244_vm6, %v233_v31  ;;  %v1455_v60 = vpop.f32.mrb[3].mxu1  ;;  %v402_v21 = vadd.f32 %v1330_v19, %v401_v59 }
 0x1bf   :  { %1576 = vmatpush3.bf16.msra.mxu0 %v1791_v30  ;;  %1470 = vmatprep.mubr.msk.f32.mxu0 %vm1629_vm3, %v1630_v4 }
 0x1c0   :  { %1577 = vmatprep.subr.bf16.mxu0 %v1627_v0 }
 0x1c3   :  { %1579 = vmatpush3.bf16.msra.mxu0 %v1800_v34 }
 0x1c4   :  { %1580 = vmatprep.subr.bf16.mxu0 %v1627_v0 }
 0x1c7   :  { %1582 = vmatpush3.bf16.msra.mxu0 %v1812_v37 }
 0x1c8   :  { %1468 = vmatprep.subr.mxu0 %v1630_v4 }
 0x1cb   :  { %1469 = vmatpush3.msk.msra.mxu0 %vm331_vm7, %v1820_v38 }
 0x1cc   :  { %1471 = vmatmul.mubr.msk.f32.vlgmr.msra.gmra.mrb[4].mxu0 %vm428_vm8, %v417_v39  ;;  %1592 = vmatprep.subr.bf16.mxu0 %v1627_v0 }
 0x1cd   :  { %1594 = vmatpush3.bf16.msra.mxu0 %v1791_v30  ;;  %1514 = vmatprep.mubr.msk.f32.mxu0 %vm1629_vm3, %v1630_v4 }
 0x1ce   :  { %1595 = vmatprep.subr.bf16.mxu0 %v1627_v0 }
 0x1d1   :  { %1597 = vmatpush3.bf16.msra.mxu0 %v1800_v34 }
 0x1d2   :  { %1598 = vmatprep.subr.bf16.mxu0 %v1627_v0 }
 0x1d5   :  { %1600 = vmatpush3.bf16.msra.mxu0 %v1812_v37 }
 0x1d6   :  { %1512 = vmatprep.subr.mxu0 %v1630_v4 }
 0x1d9   :  { %1513 = vmatpush3.msk.msra.mxu0 %vm331_vm7, %v1820_v38 }
 0x1da   :  { %1601 = vmatprep.subr.bf16.mxu0 %v1627_v0  ;;  %1515 = vmatmul.mubr.msk.f32.vlgmr.msra.gmra.mrb[6].mxu0 %vm428_vm8, %v1344_v43 }
 0x1db   :  { %1603 = vmatpush3.bf16.msra.mxu0 %v1791_v30  ;;  %1536 = vmatprep.mubr.msk.f32.mxu0 %vm1629_vm3, %v1630_v4 }
 0x1dc   :  { %1604 = vmatprep.subr.bf16.mxu0 %v1627_v0 }
 0x1df   :  { %1606 = vmatpush3.bf16.msra.mxu0 %v1800_v34 }
 0x1e0   :  { %1607 = vmatprep.subr.bf16.mxu0 %v1627_v0 }
 0x1e3   :  { %1609 = vmatpush3.bf16.msra.mxu0 %v1812_v37 }
 0x1e4   :  { %1534 = vmatprep.subr.mxu0 %v1630_v4 }
 0x1e7   :  { %1535 = vmatpush3.msk.msra.mxu0 %vm331_vm7, %v1820_v38 }
 0x1e8   :  { %1537 = vmatmul.mubr.msk.f32.vlgmr.msra.gmra.mrb[8].mxu0 %vm428_vm8, %v1351_v46 }
 0x291   :  { %v1879_v48 = vpop.f32.mrb[2].mxu0 }
 0x292   :  { %v1450_v49 = vpop.f32.mrb[3].mxu0  ;;  %v315_v23 = vadd.f32 %v1328_v22, %v1879_v48 }
 0x29f   :  { %v501_v54 = vpop.f32.mrb[4].mxu0 }
 0x2a0   :  { %v502_v55 = vadd.f32 %v501_v54, %v427_v53  ;;  %v1472_v56 = vpop.f32.mrb[5].mxu0 }
 0x2a2   :  { %1476 = vmatmul.mubr.msk.f32.vlgmr.msra.gmra.mrb[4].mxu1 %vm506_vm10, %v502_v55 }
 0x2a3   :  { %1585 = vmatpush3.bf16.msra.mxu1 %v1791_v30  ;;  %1492 = vmatprep.mubr.msk.f32.mxu1 %vm1629_vm3, %v1630_v4 }
 0x2a4   :  { %1586 = vmatprep.subr.bf16.mxu1 %v1627_v0 }
 0x2a7   :  { %1588 = vmatpush3.bf16.msra.mxu1 %v1800_v34 }
 0x2a8   :  { %1589 = vmatprep.subr.bf16.mxu1 %v1627_v0 }
 0x2ab   :  { %1591 = vmatpush3.bf16.msra.mxu1 %v1812_v37 }
 0x2ac   :  { %1490 = vmatprep.subr.mxu1 %v1630_v4 }
 0x2ad   :  { %v831_v61 = vpop.f32.mrb[6].mxu0 }
 0x2ae   :  { %v1516_v62 = vpop.f32.mrb[7].mxu0  ;;  %v832_v11 = vadd.f32 %v831_v61, %v761_v10 }
 0x2af   :  { %1491 = vmatpush3.msk.msra.mxu1 %vm331_vm7, %v1820_v38 }
 0x2b0   :  { %1493 = vmatmul.mubr.msk.f32.vlgmr.msra.gmra.mrb[6].mxu1 %vm428_vm8, %v1337_v57  ;;  %1495 = vmatprep.subr.mxu1 %v1630_v4 }
 0x2b1   :  { %1496 = vmatpush3.msk.msra.mxu1 %vm73_vm0, %v1341_v58  ;;  %1497 = vmatprep.mubr.msk.f32.mxu1 %vm1629_vm3, %v1630_v4 }
 0x2b2   :  { %1517 = vmatprep.subr.mxu1 %v1630_v4 }
 0x2bb   :  { %v996_v63 = vpop.f32.mrb[8].mxu0 }
 0x2bc   :  { %v1538_v1 = vpop.f32.mrb[9].mxu0  ;;  %v997_v15 = vadd.f32 %v996_v63, %v926_v14 }
 0x383   :  { %v666_v5 = vpop.f32.mrb[6].mxu1 }
 0x384   :  { %v667_v6 = vadd.f32 %v666_v5, %v596_v3  ;;  %v1494_v7 = vpop.f32.mrb[7].mxu1 }
 0x386   :  { %1498 = vmatmul.mubr.msk.f32.vlgmr.msra.gmra.mrb[4].mxu1 %vm506_vm10, %v667_v6 }
 0x387   :  { %1518 = vmatpush3.msk.msra.mxu1 %vm73_vm0, %v1348_v8  ;;  %1519 = vmatprep.mubr.msk.f32.mxu1 %vm1629_vm3, %v1630_v4 }
 0x388   :  { %1539 = vmatprep.subr.mxu1 %v1630_v4 }
 0x38e   :  { %1520 = vmatmul.mubr.msk.f32.vlgmr.msra.gmra.mrb[4].mxu1 %vm506_vm10, %v832_v11 }
 0x38f   :  { %1540 = vmatpush3.msk.msra.mxu1 %vm73_vm0, %v1355_v12  ;;  %1541 = vmatprep.mubr.msk.f32.mxu1 %vm1629_vm3, %v1630_v4  ;;  %vm1317_vm0 = vcmask 7168  }
 0x390   :  { %1544 = vmatprep.subr.mxu1 %v1630_v4 }
 0x396   :  { %1542 = vmatmul.mubr.msk.f32.vlgmr.msra.gmra.mrb[4].mxu1 %vm506_vm10, %v997_v15 }
 0x397   :  { %1545 = vmatpush3.msk.msra.mxu1 %vm1083_vm11, %v407_v16  ;;  %1546 = vmatprep.mubr.msk.f32.mxu1 %vm1629_vm3, %v1630_v4 }
 0x398   :  { %1610 = vmatprep.subr.bf16.mxu1 %v1627_v0  ;;  %v409_v0 = vld [vmem:[%s1977_s17] sm:$0x7] }
 0x39a   :  { %1547 = vmatmul.mubr.msk.f32.vlgmr.msra.gmra.mrb[8].mxu1 %vm1079_vm12, %v402_v21 }
 0x39b   :  { %1612 = vmatpush3.bf16.msra.mxu1 %v1611_v20  ;;  %1553 = vmatprep.mubr.msk.f32.mxu1 %vm1629_vm3, %v1630_v4 }
 0x39c   :  { %1556 = vmatprep.subr.mxu1 %v1630_v4 }
 0x39e   :  { %1554 = vmatmul.mubr.msk.f32.vlgmr.msra.gmra.mrb[10].mxu1 %vm1157_vm13, %v315_v23 }
 0x39f   :  { %1558 = vmatprep.mubr.msk.f32.mxu1 %vm1629_vm3, %v1630_v4  ;;  %1557 = vmatpush3.msk.msra.mxu1 %vm1243_vm14, %v409_v0 }
 0x469   :  { %v1074_v24 = vpop.f32.mrb[4].mxu1 }
 0x46a   :  { %v1543_v25 = vpop.f32.mrb[5].mxu1  ;;  %v1613_v28 = vadd.f32 %v1074_v24, %v408_v26 }
 0x46c   :  { %v1235_v31 = vrot.slane %v1613_v28, %v1881_v51 }
 0x46d   :  { %v1153_v27 = vpop.f32.mrb[8].mxu1 }
 0x46e   :  { %v1548_v29 = vpop.f32.mrb[9].mxu1 }
 0x471   :  { %v1227_v30 = vpop.f32.mrb[10].mxu1 }
 0x472   :  { %v1228_v32 = vadd.f32 %v1227_v30, %v1153_v27  ;;  %v1555_v4 = vpop.f32.mrb[11].mxu1 }
 0x474   :  { %v1237_v33 = vadd.f32 %v1235_v31, %v1228_v32 }
 0x476   :  { %v1238_v34 = vmax.f32 %v1237_v33, 0.0 }
 0x478   :  { %1559 = vmatmul.mubr.msk.f32.vlgmr.msra.gmra.mrb[12].mxu1 %vm1239_vm15, %v1238_v34 }
 0x54b   :  { %v1313_v35 = vpop.f32.mrb[12].mxu1 }
 0x54c   :  { %1318 = vst.msk [vmem:[%s1979_s18] sm:$0xff] %vm1317_vm0, %v1313_v35  ;;  %v1560_v36 = vpop.f32.mrb[13].mxu1 }

</bundles_post_ra>
